<compile_context>
chip_gen: v7x
topology: tpu7x:2x2x1
jax: 0.10.0
libtpu: 0.0.40
codegen_flags: <defaults>
</compile_context>

<pallas_src>
import math
import functools

import jax
import jax.numpy as jnp
from jax import lax
from jax.experimental import pallas as pl
from jax.experimental.pallas import tpu as pltpu


# ----------------------- kernel 1: row-tiled linear projection -----------------------

def _linear_kernel(x_ref, w_ref, b_ref, o_ref, *, activation):
    """One row tile of torch nn.Linear (weights pre-transposed to (K, O))."""
    y = jnp.dot(x_ref[...], w_ref[...], preferred_element_type=jnp.float32) + b_ref[...]
    if activation == "relu":
        y = jnp.maximum(y, 0.0)
    elif activation == "leaky_relu":
        y = jnp.where(y >= 0.0, y, 0.01 * y)
    elif activation == "sigmoid":
        y = jax.nn.sigmoid(y)
    o_ref[...] = y.astype(o_ref.dtype)


def linear_project(x, w_t, b_row, activation=None, row_tile=512):
    """x: (M, K), w_t: (K, O), b_row: (1, O) -> (M, O). Grid over row tiles (parallel)."""
    M, K = x.shape
    O = w_t.shape[1]
    tm = M if M <= row_tile else row_tile           # whole array at toy sizes, 512 at scale
    return pl.pallas_call(
        functools.partial(_linear_kernel, activation=activation),
        out_shape=jax.ShapeDtypeStruct((M, O), jnp.float32),
        grid=(pl.cdiv(M, tm),),
        in_specs=[pl.BlockSpec((tm, K), lambda i: (i, 0)),
                  pl.BlockSpec((K, O), lambda i: (0, 0)),     # weights fetched once
                  pl.BlockSpec((1, O), lambda i: (0, 0))],
        out_specs=pl.BlockSpec((tm, O), lambda i: (i, 0)),
        compiler_params=pltpu.CompilerParams(dimension_semantics=("parallel",)),
    )(x, w_t, b_row)


# --------- kernel 2: softmax + all-head gather + head pooling (runs once, hoisted) ---------

def _gather_pool_kernel(logits_ref, p_ref, dst_ref, gsum_ref, *,
                        num_heads, fn, scale, head_pooling_type):
    # Scaled softmax over edges for all heads at once; lane-dense (H, E).
    x = logits_ref[...]
    if scale != 1.0:      # scale is normally folded into w_edge/b_edge in the wrapper
        x = x * scale
    m = jnp.max(x, axis=-1, keepdims=True)
    ex = jnp.exp(x - m)
    att = ex / jnp.sum(ex, axis=-1, keepdims=True)            # exact divide
    if head_pooling_type == "mean":
        att = att * (1.0 / num_heads)                         # fold head-mean into att

    num_edges = x.shape[-1]
    n_nodes = p_ref.shape[1]

    # Transposed one-hot dst mask built on the fly in VMEM (never touches HBM);
    # bf16 is exact for 0/1 and selects the bf16 MXU path.
    dst = dst_ref[...]                                        # (1, E) int32
    dstT = (lax.broadcasted_iota(jnp.int32, (n_nodes, num_edges), 0)
            == dst).astype(jnp.bfloat16)                      # (N, E)

    # All heads in ONE MXU matmul, M dim = H*Fn:  g[h*Fn+f, e] = P[h, dst[e], f]
    g = lax.dot_general(p_ref[...].astype(jnp.bfloat16), dstT,
                        (((1,), (0,)), ((), ())),
                        preferred_element_type=jnp.float32)   # (H*Fn, E)

    # Per-head attention scaling + head pooling (statically unrolled over the small H).
    gsum = g[0:fn, :] * att[0:1, :]
    for h in range(1, num_heads):
        gsum = gsum + g[h * fn:(h + 1) * fn, :] * att[h:h + 1, :]
    gsum_ref[...] = gsum.astype(gsum_ref.dtype)               # (Fn, E) bf16, lane-dense


def gather_scale_pool(att_logits, p_fused, dst, *, num_heads, fn, scale, head_pooling_type):
    """att_logits: (H, E), p_fused: (H*Fn, N), dst: (E,) -> gsum (Fn, E) bf16."""
    hfn, n_nodes = p_fused.shape
    E = att_logits.shape[-1]
    dst_row = dst.reshape(1, E).astype(jnp.int32)
    # TODO(synk): for large graphs tile this call over edge chunks (online softmax) and
    # node chunks of the dst mask so nothing of size N*E is ever resident in VMEM, and
    # re-derive the VMEM budget for v7x's 64 MiB (set vmem_limit_bytes explicitly).
    return pl.pallas_call(
        functools.partial(_gather_pool_kernel, num_heads=num_heads, fn=fn,
                          scale=scale, head_pooling_type=head_pooling_type),
        out_shape=jax.ShapeDtypeStruct((fn, E), jnp.bfloat16),
        grid=(1,),
        in_specs=[pl.BlockSpec((num_heads, E), lambda i: (0, 0)),
                  pl.BlockSpec((hfn, n_nodes), lambda i: (0, 0)),
                  pl.BlockSpec((1, E), lambda i: (0, 0))],
        out_specs=pl.BlockSpec((fn, E), lambda i: (0, 0)),
        compiler_params=pltpu.CompilerParams(dimension_semantics=("arbitrary",)),
    )(att_logits, p_fused, dst_row)


# --------------- kernel 3: per-row-tile scatter-add (parallel over row tiles) ---------------

def _scatter_kernel(gsum_ref, src_ref, o_ref, *, row_tile):
    t = pl.program_id(0)
    num_edges = gsum_ref.shape[1]
    src = src_ref[...]                                        # (1, E) int32
    srcT = ((lax.broadcasted_iota(jnp.int32, (row_tile, num_edges), 0) + t * row_tile)
            == src).astype(jnp.bfloat16)                      # (Tn, E), only this tile's slab
    # out^T[f, n] = sum_e gsum[f, e] * srcT[n, e]   (bf16 x bf16 -> f32 MXU)
    o_ref[...] = lax.dot_general(gsum_ref[...], srcT,
                                 (((1,), (1,)), ((), ())),
                                 preferred_element_type=jnp.float32)


def scatter_rows(gsum, src, *, n_nodes, row_tile=None):
    fn, E = gsum.shape
    if row_tile is None:
        # Keep >= 2 row tiles (multiples of 128) when N allows so the "parallel" axis can
        # shard across v7x's two TensorCores; otherwise a single full-width tile (also
        # avoids ragged last tiles writing padded rows).
        row_tile = 256 if (n_nodes >= 512 and n_nodes % 256 == 0) else n_nodes
    src_row = src.reshape(1, E).astype(jnp.int32)
    return pl.pallas_call(
        functools.partial(_scatter_kernel, row_tile=row_tile),
        out_shape=jax.ShapeDtypeStruct((fn, n_nodes), jnp.float32),
        grid=(pl.cdiv(n_nodes, row_tile),),
        in_specs=[pl.BlockSpec((fn, E), lambda t: (0, 0)),
                  pl.BlockSpec((1, E), lambda t: (0, 0))],
        out_specs=pl.BlockSpec((fn, row_tile), lambda t: (0, t)),
        compiler_params=pltpu.CompilerParams(dimension_semantics=("parallel",)),
    )(gsum, src_row)


# ------------------------------ module forward (wrapper) ------------------------------

def mutual_multi_attention_head_forward(node_inputs, edge_inputs, src, dst, params, *,
                                        num_heads, node_in_feats, edge_in_feats,
                                        head_pooling_type="mean",
                                        linear_projection_activation=None):
    N = node_inputs.shape[0]
    E = edge_inputs.shape[0]
    H, Fn = num_heads, node_in_feats

    # One-time layout plumbing (cheap XLA ops, outside the kernels):
    # torch nn.Linear weights (O, K) -> canonical (K, O) MXU orientation.
    w_node_t = params["w_node"].T                             # (Kn, H*Fn)
    b_node = params["b_node"].reshape(1, H * Fn)
    w_edge_t = params["w_edge"].T                             # (Ke, H)
    b_edge = params["b_edge"].reshape(1, H)

    # Fold the softmax scale 1/sqrt(edge_in_feats) into the edge projection params
    # (exact for identity / (leaky_)relu since the scale is positive).
    scale = 1.0 / math.sqrt(edge_in_feats)
    if linear_projection_activation in (None, "relu", "leaky_relu"):
        w_edge_t = w_edge_t * scale
        b_edge = b_edge * scale
        kernel_scale = 1.0
    else:                                                     # e.g. sigmoid: scale in-kernel
        kernel_scale = scale

    node_out = linear_project(node_inputs, w_node_t, b_node,
                              linear_projection_activation)   # (N, H*Fn)
    # TODO(synk): the tiny edge projection (Ke x H, H < 128 lanes) barely uses the MXU;
    # a VPU broadcast-MAC path would avoid masked partial stores at large E.
    edge_logits = linear_project(edge_inputs, w_edge_t, b_edge,
                                 linear_projection_activation)  # (E, H)

    # torch .view semantics are raw row-major reshapes; then stack all heads on the MXU M
    # axis so the gather runs as one (H*Fn, N) x (N, E) matmul.
    p_fused = node_out.reshape(H, N, Fn).transpose(0, 2, 1).reshape(H * Fn, N)
    att_logits = edge_logits.reshape(H, E)                    # == .view(H, E, 1) squeezed

    # message aggregation 'sum'; dropout is identity in eval mode.
    # TODO(synk): 'mean'/'gcn' (degree-normalized) aggregation paths not implemented.
    gsum = gather_scale_pool(att_logits, p_fused, dst, num_heads=H, fn=Fn,
                             scale=kernel_scale, head_pooling_type=head_pooling_type)
    msg_t = scatter_rows(gsum, src, n_nodes=N)                # lane-dense (Fn, N)
    return jnp.transpose(msg_t)                               # (N, Fn); Fn < 128 so keep this trick


# ------------------------------- pure-JAX reference -------------------------------

def reference_forward(node_inputs, edge_inputs, src, dst, params,
                      num_heads, node_in_feats, edge_in_feats, head_pooling_type):
    N = node_inputs.shape[0]
    E = edge_inputs.shape[0]
    np_ = node_inputs @ params["w_node"].T + params["b_node"]
    np_ = np_.reshape(num_heads, N, node_in_feats)
    ep = edge_inputs @ params["w_edge"].T + params["b_edge"]
    ep = ep.reshape(num_heads, E, 1)
    att = jax.nn.softmax(ep / math.sqrt(edge_in_feats), axis=1)
    A = jnp.zeros((num_heads, N, N), jnp.float32).at[:, src, dst].set(att[:, :, 0])
    msg = jnp.einsum("hnm,hmf->hnf", A, np_)
    if head_pooling_type == "mean":
        return msg.mean(axis=0)
    return msg.sum(axis=0)


# --------------------------------------- main ---------------------------------------

if __name__ == "__main__":
    key = jax.random.PRNGKey(0)
    N, E = 12, 24
    node_in_feats, edge_in_feats, num_heads = 16, 8, 4
    keys = jax.random.split(key, 7)

    node_inputs = jax.random.normal(keys[0], (N, node_in_feats), jnp.float32)
    edge_inputs = jax.random.normal(keys[1], (E, edge_in_feats), jnp.float32)

    # unique (src, dst) pairs so the scatter-add matches torch's last-write-wins scatter.
    pair_ids = jax.random.permutation(keys[2], N * N)[:E]
    src = (pair_ids // N).astype(jnp.int32)
    dst = (pair_ids % N).astype(jnp.int32)

    bn = 1.0 / math.sqrt(node_in_feats)
    be = 1.0 / math.sqrt(edge_in_feats)
    params = {
        "w_node": jax.random.uniform(keys[3], (node_in_feats * num_heads, node_in_feats),
                                     jnp.float32, -bn, bn),
        "b_node": jax.random.uniform(keys[4], (node_in_feats * num_heads,),
                                     jnp.float32, -bn, bn),
        "w_edge": jax.random.uniform(keys[5], (num_heads, edge_in_feats),
                                     jnp.float32, -be, be),
        "b_edge": jax.random.uniform(keys[6], (num_heads,),
                                     jnp.float32, -be, be),
    }

    out = mutual_multi_attention_head_forward(
        node_inputs, edge_inputs, src, dst, params,
        num_heads=num_heads, node_in_feats=node_in_feats,
        edge_in_feats=edge_in_feats, head_pooling_type="mean")
    out = jax.block_until_ready(out)

    ref = reference_forward(node_inputs, edge_inputs, src, dst, params,
                            num_heads, node_in_feats, edge_in_feats, "mean")
    assert out.shape == (N, node_in_feats)
    # Tolerance reflects the bf16 MXU path for the gather/scatter matmuls (values and the
    # pooled gather result are each rounded to bf16 once); observed error is ~1e-3.
    assert bool(jnp.allclose(out, ref, atol=1e-2, rtol=1e-2)), "mismatch vs reference"
    print("KERNEL_OK")
</pallas_src>

<mosaic_0001>
module attributes {stable_mosaic.version = 11 : i64} {
  func.func @_linear_kernel(%arg0: i32, %arg1: memref<12x16xf32, #tpu.memory_space<vmem>>, %arg2: memref<16x64xf32, #tpu.memory_space<vmem>>, %arg3: memref<1x64xf32, #tpu.memory_space<vmem>>, %arg4: memref<12x64xf32, #tpu.memory_space<vmem>>) attributes {dimension_semantics = [#tpu.dimension_semantics<parallel>], iteration_bounds = array<i64: 1>, scalar_prefetch = 0 : i64, scratch_operands = 0 : i64, tpu.core_type = #tpu.core_type<tc>, window_params = [{transform_indices = @transform_0, window_bounds = array<i64: 12, 16>}, {pipeline_mode = #tpu.pipeline_mode<synchronous>, transform_indices = @transform_1, window_bounds = array<i64: 16, 64>}, {pipeline_mode = #tpu.pipeline_mode<synchronous>, transform_indices = @transform_2, window_bounds = array<i64: 1, 64>}, {transform_indices = @transform_3, window_bounds = array<i64: 12, 64>}]} {
    %c0 = arith.constant 0 : index
    %c0_0 = arith.constant 0 : index
    %0 = vector.load %arg1[%c0, %c0_0] : memref<12x16xf32, #tpu.memory_space<vmem>>, vector<12x16xf32>
    %c0_1 = arith.constant 0 : index
    %c0_2 = arith.constant 0 : index
    %1 = vector.load %arg2[%c0_1, %c0_2] : memref<16x64xf32, #tpu.memory_space<vmem>>, vector<16x64xf32>
    %cst = arith.constant dense<0.000000e+00> : vector<12x64xf32>
    %2 = tpu.matmul %0, %1, %cst {dimension_numbers = #tpu.dot_dimension_numbers<[1], [0], [0], [1], [0, 0, 1, 1], [], []>} : vector<12x16xf32>, vector<16x64xf32>, vector<12x64xf32> -> vector<12x64xf32>
    %c0_3 = arith.constant 0 : index
    %c0_4 = arith.constant 0 : index
    %3 = vector.load %arg3[%c0_3, %c0_4] : memref<1x64xf32, #tpu.memory_space<vmem>>, vector<1x64xf32>
    %4 = vector.broadcast %3 : vector<1x64xf32> to vector<12x64xf32>
    %5 = arith.addf %2, %4 : vector<12x64xf32>
    %c0_5 = arith.constant 0 : index
    %c0_6 = arith.constant 0 : index
    %6 = vector.load %arg4[%c0_5, %c0_6] : memref<12x64xf32, #tpu.memory_space<vmem>>, vector<12x64xf32>
    tpu.vector_store %arg4[%c0_5, %c0_6], %5 {strides = array<i32>} : memref<12x64xf32, #tpu.memory_space<vmem>>, vector<12x64xf32>,
    return
  }
  func.func @transform_0(%arg0: i32) -> (i32, i32) {
    %c0_i32 = arith.constant 0 : i32
    %c0_i32_0 = arith.constant 0 : i32
    return %arg0, %c0_i32 : i32, i32
  }
  func.func @transform_1(%arg0: i32) -> (i32, i32) {
    %c0_i32 = arith.constant 0 : i32
    %c0_i32_0 = arith.constant 0 : i32
    %c0_i32_1 = arith.constant 0 : i32
    return %c0_i32, %c0_i32_0 : i32, i32
  }
  func.func @transform_2(%arg0: i32) -> (i32, i32) {
    %c0_i32 = arith.constant 0 : i32
    %c0_i32_0 = arith.constant 0 : i32
    %c0_i32_1 = arith.constant 0 : i32
    return %c0_i32, %c0_i32_0 : i32, i32
  }
  func.func @transform_3(%arg0: i32) -> (i32, i32) {
    %c0_i32 = arith.constant 0 : i32
    %c0_i32_0 = arith.constant 0 : i32
    return %arg0, %c0_i32 : i32, i32
  }
}

</mosaic_0001>

<bundles_post_ra>
// kernel: tpu_custom_call.1
= control target key start
LH: loop header
LB: loop body
LE: loop exit
PB: predicated region body
PF: predicated region fallthrough
CT: control target
= control target key end

     0   :  { %8 = vsyncpa [#allocation3], 0  ;;  %s326_s0 = inlined_call_operand.hbm [shape: f32[12,16], index: 0, kind: input, shape index: {}]   ;;  %s327_s1 = inlined_call_operand.hbm [shape: f32[16,64], index: 1, kind: input, shape index: {}]   ;;  %s328_s2 = inlined_call_operand.vmem [shape: f32[1,64], index: 2, kind: input, shape index: {}]   ;;  %s329_s3 = inlined_call_operand.hbm [shape: f32[12,64], index: 3, kind: output, shape index: {}]  }
   0x1   :  { %9 = vsyncpa [#allocation6], 0 }
   0x2   :  { %10 = vsyncpa [#allocation4], 0  ;;  %s253_s12 = smov [#allocation2]   ;;  %s181_s16 = scalar_lea.hbm %s326_s0, 256 }
   0x3   :  { %s16_s13 = sshll.u32 %s253_s12, 4  ;;  %p182_p0 = scmp.ne.s32.totalorder %s326_s0, %s181_s16  ;;  %s17_s13 = int_to_ptr.vmem [resolvable:$true] %s16_s13 }
   0x4   :  { %p185_p1 = scmp.lt.u32.totalorder %s181_s16, %s326_s0 }
   0x6   :  { %p187_p2 = pnand %p185_p1, %p182_p0 }
   0x8   :  { %190 = shalt.err (!%p187_p2)
}
   0x9   :  { %s191_s21 = scalar_lea.vmem %s17_s13, 256  ;;  %p196_p4 = scmp.lt.s32.totalorder %s17_s13, %s17_s13 }
   0xa   :  { %p192_p3 = scmp.ne.s32.totalorder %s17_s13, %s191_s21  ;;  %p197_p5 = scmp.lt.s32.totalorder %s191_s21, %s191_s21 }
   0xc   :  { %p198_p6 = por %p197_p5, %p196_p4 }
   0xe   :  { %p199_p7 = pnand %p198_p6, %p192_p3 }
  0x10   :  { %202 = shalt.err (!%p199_p7)
}
  0x11   :  { %s254_s22 = smov 128   ;;  %s255_s23 = smov 8  }
  0x12   :  { %22 = dma.hbm_to_vmem [thread:$0]  %s326_s0, 256, %s17_s13, [#allocation3], %s254_s22, %s254_s22, %s255_s23  }
  0x13   :  { %s256_s26 = smov [#allocation5]   ;;  %s203_s30 = scalar_lea.hbm %s327_s1, 256 }
  0x14   :  { %s28_s27 = sshll.u32 %s256_s26, 4  ;;  %p204_p8 = scmp.ne.s32.totalorder %s327_s1, %s203_s30  ;;  %s29_s27 = int_to_ptr.vmem [resolvable:$true] %s28_s27 }
  0x15   :  { %p207_p9 = scmp.lt.u32.totalorder %s203_s30, %s327_s1 }
  0x17   :  { %p209_p10 = pnand %p207_p9, %p204_p8 }
  0x19   :  { %212 = shalt.err (!%p209_p10)
}
  0x1a   :  { %s213_s8 = scalar_lea.vmem %s29_s27, 256  ;;  %p218_p12 = scmp.lt.s32.totalorder %s29_s27, %s29_s27 }
  0x1b   :  { %p214_p11 = scmp.ne.s32.totalorder %s29_s27, %s213_s8  ;;  %p219_p13 = scmp.lt.s32.totalorder %s213_s8, %s213_s8 }
  0x1d   :  { %p220_p0 = por %p219_p13, %p218_p12 }
  0x1f   :  { %p221_p1 = pnand %p220_p0, %p214_p11 }
  0x21   :  { %224 = shalt.err (!%p221_p1)
}
  0x22   :  { %34 = dma.hbm_to_vmem [thread:$0]  %s327_s1, 256, %s29_s27, [#allocation6], %s254_s22, %s254_s22, %s255_s23  }
  0x23   :  { %247 = dma.done.wait [#allocation3], 256  }
  0x24   :  { %248 = vsyncadd [#allocation3], 4294967040 }
  0x25   :  { %249 = dma.done.wait [#allocation6], 256  }
  0x26   :  { %250 = vsyncadd [#allocation6], 4294967040  ;;  %vm54_vm0 = vcmask 130048   ;;  %v45_v0 = vld [vmem:[#allocation5] sm:$0xff]  ;;  %v46_v1 = vld [vmem:[#allocation5 + $0x8] sm:$0xff]  ;;  %s257_s12 = smov [#allocation7]  }
  0x27   :  { %v43_v2 = vld [vmem:[#allocation2] sm:$0xff]  ;;  %v172_v3 = vpack.c.bf16 %v46_v1, %v45_v0  ;;  %v44_v4 = vld [vmem:[#allocation2 + $0x8] sm:$0xf]  ;;  %s145_s1 = sshll.u32 %s257_s12, 4  ;;  %vm138_vm1 = vcmask 519168   ;;  %vm136_vm2 = vcmask 523264   ;;  %s146_s1 = int_to_ptr.vmem [resolvable:$true] %s145_s1 }
  0x28   :  { %169 = vmatprep.mubr.msk.f32.mxu0 %vm54_vm0, %v43_v2  ;;  %v158_v5 = vld [vmem:[%s328_s2] ss:$0 sm:$0xff]  ;;  %s225_s13 = scalar_lea.vmem %s146_s1, 256  ;;  %p230_p3 = scmp.lt.s32.totalorder %s146_s1, %s146_s1 }
  0x29   :  { %173 = vmatprep.subr.bf16.mxu0 %v172_v3  ;;  %p226_p2 = scmp.ne.s32.totalorder %s146_s1, %s225_s13  ;;  %p231_p4 = scmp.lt.s32.totalorder %s225_s13, %s225_s13 }
  0x2a   :  { %175 = vmatpush3.bf16.msra.mxu0 %v172_v3 }
  0x2b   :  { %p232_p5 = por %p231_p4, %p230_p3 }
  0x2d   :  { %170 = vmatmul.mubr.msk.f32.vlgmr.msra.gmra.mrb[0].mxu0 %vm54_vm0, %v44_v4  ;;  %p233_p6 = pnand %p232_p5, %p226_p2 }
 0x100   :  { %v171_v6 = vpop.f32.mrb[0].mxu0 }
 0x101   :  { %v133_v7 = vadd.f32 %v171_v6, %v158_v5  ;;  %v127_v8 = vpop.f32.mrb[1].mxu0 }
 0x102   :  { %v128_v9 = vadd.f32 %v158_v5, %v127_v8 }
 0x103   :  { %139 = vst.msk [vmem:[#allocation7 + $0x8] sm:$0xf] %vm138_vm1, %v133_v7 }
 0x104   :  { %137 = vst.msk [vmem:[#allocation7] sm:$0xff] %vm136_vm2, %v128_v9 }
 0x105   :  { %236 = shalt.err (!%p233_p6)
}
 0x106   :  { %s237_s15 = scalar_lea.hbm %s329_s3, 256 }
 0x107   :  { %p238_p7 = scmp.ne.s32.totalorder %s329_s3, %s237_s15  ;;  %p241_p8 = scmp.lt.u32.totalorder %s237_s15, %s329_s3 }
 0x109   :  { %p243_p9 = pnand %p241_p8, %p238_p7 }
 0x10b   :  { %246 = shalt.err (!%p243_p9)
}
 0x10c   :  { %151 = dma.vmem_to_hbm [thread:$0]  %s146_s1, 256, %s329_s3, [#allocation4], %s254_s22, %s254_s22, %s255_s23  }
 0x10d   :  { %251 = dma.done.wait [#allocation4], 256  }
 0x10e   :  { %252 = vsyncadd [#allocation4], 4294967040 }
 0x10f   :  { %155 = vsyncpa [#allocation3], 1 }
 0x110   :  { %156 = vsyncpa [#allocation6], 1 }
 0x111   :  { %157 = vsyncpa [#allocation4], 1 }

</bundles_post_ra>
